<compile_context>
chip_gen: v6e
topology: v6e:2x2x1
jax: 0.10.0
libtpu: 0.0.40
codegen_flags: <defaults>
</compile_context>

<pallas_src>
import functools

import jax
import jax.numpy as jnp
from jax.experimental import pallas as pl
from jax.experimental.pallas import tpu as pltpu

KSIZE = 3
PAD = 1
CPAD = 8  # output channels padded to one full sublane group


def _convt_sigmoid_kernel(win_ref, bld_ref, ww_ref, wb_ref, b_ref, o_ref, *, width):
    """Fused concat + ConvTranspose2d(s=1,p=1) + Sigmoid, whole batch in one grid step.

    win_ref / bld_ref: (N, C_half, H*W)  channel-major, lane-dense flattened spatial
    ww_ref / wb_ref:   (9*CPAD, C_half)  stacked per-tap conv weights (rows 3..7 of each
                                         8-row tap group are zero), window / blind halves
    b_ref:             (CPAD, 1)         bias (rows 3..7 zero)
    o_ref:             (N, CPAD, H*W)    output, NCHW-flat, channel dim padded to 8
    """
    n_img = o_ref.shape[0]
    hw = o_ref.shape[2]
    W = width

    # Lane-index -> (h, w) border masks implementing the conv's zero padding.
    p = jax.lax.broadcasted_iota(jnp.int32, (1, hw), 1)
    w_idx = jax.lax.rem(p, W)
    kh_masks = [p >= W, None, p < hw - W]          # 0 <= h + kh - 1 < H
    kw_masks = [w_idx >= 1, None, w_idx <= W - 2]  # 0 <= w + kw - 1 < W

    # Bias folded into the accumulator init; hoisted out of all loops (no re-broadcast).
    bias = jnp.broadcast_to(b_ref[...].astype(jnp.float32), (CPAD, hw))

    ww = ww_ref[...]                               # (9*CPAD, C_half)
    wb = wb_ref[...]

    for n in range(n_img):                         # N is tiny & static: unrolled
        # One stacked matmul per input half: all 9 taps at once, un-shifted image as the
        # stationary RHS.  Replaces 9 tiny matmuls + an in-kernel channel concat.
        t = (jnp.dot(ww, win_ref[n], preferred_element_type=jnp.float32)
             + jnp.dot(wb, bld_ref[n], preferred_element_type=jnp.float32))  # (72, HW)

        acc = bias
        for kh in range(KSIZE):
            for kw in range(KSIZE):
                tap = kh * KSIZE + kw
                d = (kh - 1) * W + (kw - 1)        # flat spatial offset of this tap
                # Sublane-aligned static 8-row slab (rows 3..7 are exactly zero).
                slab = t[tap * CPAD:(tap + 1) * CPAD, :]
                if d != 0:
                    # Roll the small (8, HW) result, not the (64, HW) input: identical
                    # math, ~8x less XLU work, same border masks.
                    slab = pltpu.roll(slab, shift=(-d) % hw, axis=1)
                mask = kh_masks[kh]
                if kw_masks[kw] is not None:
                    mask = kw_masks[kw] if mask is None else jnp.logical_and(mask, kw_masks[kw])
                if mask is not None:
                    slab = jnp.where(mask, slab, 0.0)
                acc = acc + slab

        # Full-sublane, lane-dense store (channel dim padded to 8 -> unmasked vst).
        o_ref[n] = jax.nn.sigmoid(acc)


def lighting_adjuster_forward(window_features, blind_features, w_t, b_t):
    """window_features, blind_features: NCHW float32 (N, 32, H, W).
    w_t: ConvTranspose2d weight, shape (Cin=64, Cout=3, 3, 3).  b_t: (3,).
    Returns NCHW (N, 3, H, W) float32, matching the PyTorch module."""
    N, c_half, H, W = window_features.shape
    assert blind_features.shape == (N, c_half, H, W)
    cin = 2 * c_half
    cout = w_t.shape[1]
    hw = H * W

    # Free (metadata-only) reshapes: (N, C, H, W) -> (N, C, H*W).
    win = window_features.reshape(N, c_half, hw)
    bld = blind_features.reshape(N, c_half, hw)

    # ConvTranspose2d(s=1,p=1) == Conv2d(p=1) with K[co,ci,kh,kw] = Wt[ci,co,2-kh,2-kw].
    # Pack per-tap as (9, Cout, Cin), zero-pad each tap's output rows to a full 8-sublane
    # group, stack to (72, Cin), and split the Cin columns into window / blind halves so
    # the kernel never has to concatenate the inputs.
    w_k = jnp.transpose(jnp.flip(w_t, axis=(2, 3)), (2, 3, 1, 0)).reshape(
        KSIZE * KSIZE, cout, cin).astype(jnp.float32)
    w_pad = jnp.zeros((KSIZE * KSIZE, CPAD, cin), jnp.float32).at[:, :cout, :].set(w_k)
    w_stack = w_pad.reshape(KSIZE * KSIZE * CPAD, cin)
    w_win = w_stack[:, :c_half]                    # (72, 32)
    w_bld = w_stack[:, c_half:]                    # (72, 32)
    b_pad = jnp.zeros((CPAD, 1), jnp.float32).at[:cout, 0].set(b_t.astype(jnp.float32))

    kernel = functools.partial(_convt_sigmoid_kernel, width=W)

    # VMEM request from the real footprint: double-buffered blocks + in-kernel temps.
    itemsize = 4
    block_bytes = itemsize * 2 * (2 * N * c_half * hw          # win + bld blocks
                                  + 2 * KSIZE * KSIZE * CPAD * c_half   # weight halves
                                  + CPAD * 1                   # bias
                                  + N * CPAD * hw)             # output block
    temp_bytes = itemsize * (KSIZE * KSIZE * CPAD * hw          # stacked tap results t
                             + 3 * CPAD * hw                    # acc / rolled / masked slabs
                             + 4 * hw)                          # iota + masks
    vmem_limit = int(max(2 << 20, min(48 << 20, 2 * (block_bytes + temp_bytes))))

    out_flat = pl.pallas_call(
        kernel,
        out_shape=jax.ShapeDtypeStruct((N, CPAD, hw), jnp.float32),
        grid_spec=pltpu.PrefetchScalarGridSpec(
            num_scalar_prefetch=0,
            grid=(1,),                              # single step: no per-image pipeline overhead
            in_specs=[
                pl.BlockSpec((N, c_half, hw), lambda i: (0, 0, 0)),
                pl.BlockSpec((N, c_half, hw), lambda i: (0, 0, 0)),
                pl.BlockSpec((KSIZE * KSIZE * CPAD, c_half), lambda i: (0, 0)),
                pl.BlockSpec((KSIZE * KSIZE * CPAD, c_half), lambda i: (0, 0)),
                pl.BlockSpec((CPAD, 1), lambda i: (0, 0)),
            ],
            out_specs=pl.BlockSpec((N, CPAD, hw), lambda i: (0, 0, 0)),
        ),
        compiler_params=pltpu.CompilerParams(
            dimension_semantics=("arbitrary",),
            vmem_limit_bytes=vmem_limit,
        ),
    )(win, bld, w_win, w_bld, b_pad)

    # Drop the padded channels (tiny fused slice) and reshape back to NCHW (free).
    return out_flat[:, :cout, :].reshape(N, cout, H, W)


if __name__ == "__main__":
    key = jax.random.PRNGKey(0)
    k1, k2, k3, k4 = jax.random.split(key, 4)

    # forward() concatenates to 64 channels -> each input carries 32 channels.
    N, C_half, H, W = 2, 32, 16, 16
    Cin, Cout = 2 * C_half, 3

    window_features = jax.random.normal(k1, (N, C_half, H, W), jnp.float32)
    blind_features = jax.random.normal(k2, (N, C_half, H, W), jnp.float32)

    # Deterministic synthetic parameters (ConvTranspose2d(64, 3, 3, padding=1)).
    w_t = jax.random.normal(k3, (Cin, Cout, KSIZE, KSIZE), jnp.float32) * 0.05
    b_t = jax.random.normal(k4, (Cout,), jnp.float32) * 0.05

    out = lighting_adjuster_forward(window_features, blind_features, w_t, b_t)
    out = jax.block_until_ready(out)

    # Pure-JAX reference (same conv-equivalent formulation) for a sanity check.
    x = jnp.concatenate([window_features, blind_features], axis=1)
    w_ref = jnp.transpose(jnp.flip(w_t, axis=(2, 3)), (1, 0, 2, 3))  # (Cout, Cin, 3, 3)
    ref = jax.lax.conv_general_dilated(
        x, w_ref, window_strides=(1, 1), padding=((PAD, PAD), (PAD, PAD)),
        dimension_numbers=("NCHW", "OIHW", "NCHW"))
    ref = jax.nn.sigmoid(ref + b_t.reshape(1, Cout, 1, 1))

    assert out.shape == (N, Cout, H, W), out.shape
    assert float(jnp.max(jnp.abs(out - ref))) < 1e-5

    # TODO(synk): self.encoder (Conv2d(3,64)+ReLU+MaxPool2d) is dead code in forward();
    # intentionally not implemented.
    print("KERNEL_OK")
</pallas_src>

<mosaic_0001>
module attributes {stable_mosaic.version = 11 : i64} {
  func.func @_convt_sigmoid_kernel(%arg0: i32, %arg1: memref<2x32x256xf32, #tpu.memory_space<vmem>>, %arg2: memref<2x32x256xf32, #tpu.memory_space<vmem>>, %arg3: memref<72x32xf32, #tpu.memory_space<vmem>>, %arg4: memref<72x32xf32, #tpu.memory_space<vmem>>, %arg5: memref<8x1xf32, #tpu.memory_space<vmem>>, %arg6: memref<2x8x256xf32, #tpu.memory_space<vmem>>) attributes {dimension_semantics = [#tpu.dimension_semantics<arbitrary>], iteration_bounds = array<i64: 1>, scalar_prefetch = 0 : i64, scratch_operands = 0 : i64, tpu.core_type = #tpu.core_type<tc>, window_params = [{pipeline_mode = #tpu.pipeline_mode<synchronous>, transform_indices = @transform_0, window_bounds = array<i64: 2, 32, 256>}, {pipeline_mode = #tpu.pipeline_mode<synchronous>, transform_indices = @transform_1, window_bounds = array<i64: 2, 32, 256>}, {pipeline_mode = #tpu.pipeline_mode<synchronous>, transform_indices = @transform_2, window_bounds = array<i64: 72, 32>}, {pipeline_mode = #tpu.pipeline_mode<synchronous>, transform_indices = @transform_3, window_bounds = array<i64: 72, 32>}, {pipeline_mode = #tpu.pipeline_mode<synchronous>, transform_indices = @transform_4, window_bounds = array<i64: 8, 1>}, {pipeline_mode = #tpu.pipeline_mode<synchronous>, transform_indices = @transform_5, window_bounds = array<i64: 2, 8, 256>}]} {
    %0 = tpu.iota {dimensions = array<i32: 1>} : vector<1x256xi32>
    %c16_i32 = arith.constant 16 : i32
    %1 = vector.broadcast %c16_i32 : i32 to vector<1x256xi32>
    %2 = arith.remsi %0, %1 : vector<1x256xi32>
    %c16_i32_0 = arith.constant 16 : i32
    %3 = vector.broadcast %c16_i32_0 : i32 to vector<1x256xi32>
    %4 = arith.cmpi sge, %0, %3 : vector<1x256xi32>
    %c240_i32 = arith.constant 240 : i32
    %5 = vector.broadcast %c240_i32 : i32 to vector<1x256xi32>
    %6 = arith.cmpi slt, %0, %5 : vector<1x256xi32>
    %c1_i32 = arith.constant 1 : i32
    %7 = vector.broadcast %c1_i32 : i32 to vector<1x256xi32>
    %8 = arith.cmpi sge, %2, %7 : vector<1x256xi32>
    %c14_i32 = arith.constant 14 : i32
    %9 = vector.broadcast %c14_i32 : i32 to vector<1x256xi32>
    %10 = arith.cmpi sle, %2, %9 : vector<1x256xi32>
    %c0 = arith.constant 0 : index
    %c0_1 = arith.constant 0 : index
    %11 = vector.load %arg5[%c0, %c0_1] : memref<8x1xf32, #tpu.memory_space<vmem>>, vector<8x1xf32>
    %12 = vector.shape_cast %11 : vector<8x1xf32> to vector<8x1xf32>
    %13 = vector.broadcast %12 : vector<8x1xf32> to vector<8x256xf32>
    %c0_2 = arith.constant 0 : index
    %c0_3 = arith.constant 0 : index
    %14 = vector.load %arg3[%c0_2, %c0_3] : memref<72x32xf32, #tpu.memory_space<vmem>>, vector<72x32xf32>
    %c0_4 = arith.constant 0 : index
    %c0_5 = arith.constant 0 : index
    %15 = vector.load %arg4[%c0_4, %c0_5] : memref<72x32xf32, #tpu.memory_space<vmem>>, vector<72x32xf32>
    %c0_6 = arith.constant 0 : index
    %c0_7 = arith.constant 0 : index
    %c0_8 = arith.constant 0 : index
    %16 = vector.load %arg1[%c0_6, %c0_7, %c0_8] : memref<2x32x256xf32, #tpu.memory_space<vmem>>, vector<1x32x256xf32>
    %17 = vector.shape_cast %16 : vector<1x32x256xf32> to vector<32x256xf32>
    %cst = arith.constant dense<0.000000e+00> : vector<72x256xf32>
    %18 = tpu.matmul %14, %17, %cst {dimension_numbers = #tpu.dot_dimension_numbers<[1], [0], [0], [1], [0, 0, 1, 1], [], []>} : vector<72x32xf32>, vector<32x256xf32>, vector<72x256xf32> -> vector<72x256xf32>
    %c0_9 = arith.constant 0 : index
    %c0_10 = arith.constant 0 : index
    %c0_11 = arith.constant 0 : index
    %19 = vector.load %arg2[%c0_9, %c0_10, %c0_11] : memref<2x32x256xf32, #tpu.memory_space<vmem>>, vector<1x32x256xf32>
    %20 = vector.shape_cast %19 : vector<1x32x256xf32> to vector<32x256xf32>
    %cst_12 = arith.constant dense<0.000000e+00> : vector<72x256xf32>
    %21 = tpu.matmul %15, %20, %cst_12 {dimension_numbers = #tpu.dot_dimension_numbers<[1], [0], [0], [1], [0, 0, 1, 1], [], []>} : vector<72x32xf32>, vector<32x256xf32>, vector<72x256xf32> -> vector<72x256xf32>
    %22 = arith.addf %18, %21 : vector<72x256xf32>
    %23 = vector.extract_strided_slice %22 {offsets = [0, 0], sizes = [8, 256], strides = [1, 1]} : vector<72x256xf32> to vector<8x256xf32>
    %c17_i32 = arith.constant 17 : i32
    %24 = tpu.dynamic_rotate %23 by %c17_i32 dim 1 : vector<8x256xf32>, i32 -> vector<8x256xf32>
    %25 = arith.andi %4, %8 : vector<1x256xi1>
    %cst_13 = arith.constant 0.000000e+00 : f32
    %26 = vector.shape_cast %25 : vector<1x256xi1> to vector<1x256xi1>
    %27 = vector.broadcast %26 : vector<1x256xi1> to vector<8x256xi1>
    %28 = vector.broadcast %cst_13 : f32 to vector<8x256xf32>
    %29 = arith.select %27, %24, %28 : vector<8x256xi1>, vector<8x256xf32>
    %30 = arith.addf %13, %29 : vector<8x256xf32>
    %31 = vector.extract_strided_slice %22 {offsets = [8, 0], sizes = [8, 256], strides = [1, 1]} : vector<72x256xf32> to vector<8x256xf32>
    %c16_i32_14 = arith.constant 16 : i32
    %32 = tpu.dynamic_rotate %31 by %c16_i32_14 dim 1 : vector<8x256xf32>, i32 -> vector<8x256xf32>
    %cst_15 = arith.constant 0.000000e+00 : f32
    %33 = vector.shape_cast %4 : vector<1x256xi1> to vector<1x256xi1>
    %34 = vector.broadcast %33 : vector<1x256xi1> to vector<8x256xi1>
    %35 = vector.broadcast %cst_15 : f32 to vector<8x256xf32>
    %36 = arith.select %34, %32, %35 : vector<8x256xi1>, vector<8x256xf32>
    %37 = arith.addf %30, %36 : vector<8x256xf32>
    %38 = vector.extract_strided_slice %22 {offsets = [16, 0], sizes = [8, 256], strides = [1, 1]} : vector<72x256xf32> to vector<8x256xf32>
    %c15_i32 = arith.constant 15 : i32
    %39 = tpu.dynamic_rotate %38 by %c15_i32 dim 1 : vector<8x256xf32>, i32 -> vector<8x256xf32>
    %40 = arith.andi %4, %10 : vector<1x256xi1>
    %cst_16 = arith.constant 0.000000e+00 : f32
    %41 = vector.shape_cast %40 : vector<1x256xi1> to vector<1x256xi1>
    %42 = vector.broadcast %41 : vector<1x256xi1> to vector<8x256xi1>
    %43 = vector.broadcast %cst_16 : f32 to vector<8x256xf32>
    %44 = arith.select %42, %39, %43 : vector<8x256xi1>, vector<8x256xf32>
    %45 = arith.addf %37, %44 : vector<8x256xf32>
    %46 = vector.extract_strided_slice %22 {offsets = [24, 0], sizes = [8, 256], strides = [1, 1]} : vector<72x256xf32> to vector<8x256xf32>
    %c1_i32_17 = arith.constant 1 : i32
    %47 = tpu.dynamic_rotate %46 by %c1_i32_17 dim 1 : vector<8x256xf32>, i32 -> vector<8x256xf32>
    %cst_18 = arith.constant 0.000000e+00 : f32
    %48 = vector.shape_cast %8 : vector<1x256xi1> to vector<1x256xi1>
    %49 = vector.broadcast %48 : vector<1x256xi1> to vector<8x256xi1>
    %50 = vector.broadcast %cst_18 : f32 to vector<8x256xf32>
    %51 = arith.select %49, %47, %50 : vector<8x256xi1>, vector<8x256xf32>
    %52 = arith.addf %45, %51 : vector<8x256xf32>
    %53 = vector.extract_strided_slice %22 {offsets = [32, 0], sizes = [8, 256], strides = [1, 1]} : vector<72x256xf32> to vector<8x256xf32>
    %54 = arith.addf %52, %53 : vector<8x256xf32>
    %55 = vector.extract_strided_slice %22 {offsets = [40, 0], sizes = [8, 256], strides = [1, 1]} : vector<72x256xf32> to vector<8x256xf32>
    %c255_i32 = arith.constant 255 : i32
    %56 = tpu.dynamic_rotate %55 by %c255_i32 dim 1 : vector<8x256xf32>, i32 -> vector<8x256xf32>
    %cst_19 = arith.constant 0.000000e+00 : f32
    %57 = vector.shape_cast %10 : vector<1x256xi1> to vector<1x256xi1>
    %58 = vector.broadcast %57 : vector<1x256xi1> to vector<8x256xi1>
    %59 = vector.broadcast %cst_19 : f32 to vector<8x256xf32>
    %60 = arith.select %58, %56, %59 : vector<8x256xi1>, vector<8x256xf32>
    %61 = arith.addf %54, %60 : vector<8x256xf32>
    %62 = vector.extract_strided_slice %22 {offsets = [48, 0], sizes = [8, 256], strides = [1, 1]} : vector<72x256xf32> to vector<8x256xf32>
    %c241_i32 = arith.constant 241 : i32
    %63 = tpu.dynamic_rotate %62 by %c241_i32 dim 1 : vector<8x256xf32>, i32 -> vector<8x256xf32>
    %64 = arith.andi %6, %8 : vector<1x256xi1>
    %cst_20 = arith.constant 0.000000e+00 : f32
    %65 = vector.shape_cast %64 : vector<1x256xi1> to vector<1x256xi1>
    %66 = vector.broadcast %65 : vector<1x256xi1> to vector<8x256xi1>
    %67 = vector.broadcast %cst_20 : f32 to vector<8x256xf32>
    %68 = arith.select %66, %63, %67 : vector<8x256xi1>, vector<8x256xf32>
    %69 = arith.addf %61, %68 : vector<8x256xf32>
    %70 = vector.extract_strided_slice %22 {offsets = [56, 0], sizes = [8, 256], strides = [1, 1]} : vector<72x256xf32> to vector<8x256xf32>
    %c240_i32_21 = arith.constant 240 : i32
    %71 = tpu.dynamic_rotate %70 by %c240_i32_21 dim 1 : vector<8x256xf32>, i32 -> vector<8x256xf32>
    %cst_22 = arith.constant 0.000000e+00 : f32
    %72 = vector.shape_cast %6 : vector<1x256xi1> to vector<1x256xi1>
    %73 = vector.broadcast %72 : vector<1x256xi1> to vector<8x256xi1>
    %74 = vector.broadcast %cst_22 : f32 to vector<8x256xf32>
    %75 = arith.select %73, %71, %74 : vector<8x256xi1>, vector<8x256xf32>
    %76 = arith.addf %69, %75 : vector<8x256xf32>
    %77 = vector.extract_strided_slice %22 {offsets = [64, 0], sizes = [8, 256], strides = [1, 1]} : vector<72x256xf32> to vector<8x256xf32>
    %c239_i32 = arith.constant 239 : i32
    %78 = tpu.dynamic_rotate %77 by %c239_i32 dim 1 : vector<8x256xf32>, i32 -> vector<8x256xf32>
    %79 = arith.andi %6, %10 : vector<1x256xi1>
    %cst_23 = arith.constant 0.000000e+00 : f32
    %80 = vector.shape_cast %79 : vector<1x256xi1> to vector<1x256xi1>
    %81 = vector.broadcast %80 : vector<1x256xi1> to vector<8x256xi1>
    %82 = vector.broadcast %cst_23 : f32 to vector<8x256xf32>
    %83 = arith.select %81, %78, %82 : vector<8x256xi1>, vector<8x256xf32>
    %84 = arith.addf %76, %83 : vector<8x256xf32>
    %85 = arith.negf %84 : vector<8x256xf32>
    %86 = math.exp %85 : vector<8x256xf32>
    %cst_24 = arith.constant 1.000000e+00 : f32
    %87 = vector.broadcast %cst_24 : f32 to vector<8x256xf32>
    %88 = arith.addf %87, %86 : vector<8x256xf32>
    %89 = arith.divf %87, %88 : vector<8x256xf32>
    %c0_25 = arith.constant 0 : index
    %c0_26 = arith.constant 0 : index
    %c0_27 = arith.constant 0 : index
    %90 = vector.load %arg6[%c0_25, %c0_26, %c0_27] : memref<2x8x256xf32, #tpu.memory_space<vmem>>, vector<1x8x256xf32>
    %91 = vector.shape_cast %90 : vector<1x8x256xf32> to vector<8x256xf32>
    %92 = vector.shape_cast %89 : vector<8x256xf32> to vector<1x8x256xf32>
    tpu.vector_store %arg6[%c0_25, %c0_26, %c0_27], %92 {strides = array<i32>} : memref<2x8x256xf32, #tpu.memory_space<vmem>>, vector<1x8x256xf32>,
    %c1 = arith.constant 1 : index
    %c0_28 = arith.constant 0 : index
    %c0_29 = arith.constant 0 : index
    %93 = vector.load %arg1[%c1, %c0_28, %c0_29] : memref<2x32x256xf32, #tpu.memory_space<vmem>>, vector<1x32x256xf32>
    %94 = vector.shape_cast %93 : vector<1x32x256xf32> to vector<32x256xf32>
    %cst_30 = arith.constant dense<0.000000e+00> : vector<72x256xf32>
    %95 = tpu.matmul %14, %94, %cst_30 {dimension_numbers = #tpu.dot_dimension_numbers<[1], [0], [0], [1], [0, 0, 1, 1], [], []>} : vector<72x32xf32>, vector<32x256xf32>, vector<72x256xf32> -> vector<72x256xf32>
    %c1_31 = arith.constant 1 : index
    %c0_32 = arith.constant 0 : index
    %c0_33 = arith.constant 0 : index
    %96 = vector.load %arg2[%c1_31, %c0_32, %c0_33] : memref<2x32x256xf32, #tpu.memory_space<vmem>>, vector<1x32x256xf32>
    %97 = vector.shape_cast %96 : vector<1x32x256xf32> to vector<32x256xf32>
    %cst_34 = arith.constant dense<0.000000e+00> : vector<72x256xf32>
    %98 = tpu.matmul %15, %97, %cst_34 {dimension_numbers = #tpu.dot_dimension_numbers<[1], [0], [0], [1], [0, 0, 1, 1], [], []>} : vector<72x32xf32>, vector<32x256xf32>, vector<72x256xf32> -> vector<72x256xf32>
    %99 = arith.addf %95, %98 : vector<72x256xf32>
    %100 = vector.extract_strided_slice %99 {offsets = [0, 0], sizes = [8, 256], strides = [1, 1]} : vector<72x256xf32> to vector<8x256xf32>
    %c17_i32_35 = arith.constant 17 : i32
    %101 = tpu.dynamic_rotate %100 by %c17_i32_35 dim 1 : vector<8x256xf32>, i32 -> vector<8x256xf32>
    %102 = arith.andi %4, %8 : vector<1x256xi1>
    %cst_36 = arith.constant 0.000000e+00 : f32
    %103 = vector.shape_cast %102 : vector<1x256xi1> to vector<1x256xi1>
    %104 = vector.broadcast %103 : vector<1x256xi1> to vector<8x256xi1>
    %105 = vector.broadcast %cst_36 : f32 to vector<8x256xf32>
    %106 = arith.select %104, %101, %105 : vector<8x256xi1>, vector<8x256xf32>
    %107 = arith.addf %13, %106 : vector<8x256xf32>
    %108 = vector.extract_strided_slice %99 {offsets = [8, 0], sizes = [8, 256], strides = [1, 1]} : vector<72x256xf32> to vector<8x256xf32>
    %c16_i32_37 = arith.constant 16 : i32
    %109 = tpu.dynamic_rotate %108 by %c16_i32_37 dim 1 : vector<8x256xf32>, i32 -> vector<8x256xf32>
    %cst_38 = arith.constant 0.000000e+00 : f32
    %110 = vector.shape_cast %4 : vector<1x256xi1> to vector<1x256xi1>
    %111 = vector.broadcast %110 : vector<1x256xi1> to vector<8x256xi1>
    %112 = vector.broadcast %cst_38 : f32 to vector<8x256xf32>
    %113 = arith.select %111, %109, %112 : vector<8x256xi1>, vector<8x256xf32>
    %114 = arith.addf %107, %113 : vector<8x256xf32>
    %115 = vector.extract_strided_slice %99 {offsets = [16, 0], sizes = [8, 256], strides = [1, 1]} : vector<72x256xf32> to vector<8x256xf32>
    %c15_i32_39 = arith.constant 15 : i32
    %116 = tpu.dynamic_rotate %115 by %c15_i32_39 dim 1 : vector<8x256xf32>, i32 -> vector<8x256xf32>
    %117 = arith.andi %4, %10 : vector<1x256xi1>
    %cst_40 = arith.constant 0.000000e+00 : f32
    %118 = vector.shape_cast %117 : vector<1x256xi1> to vector<1x256xi1>
    %119 = vector.broadcast %118 : vector<1x256xi1> to vector<8x256xi1>
    %120 = vector.broadcast %cst_40 : f32 to vector<8x256xf32>
    %121 = arith.select %119, %116, %120 : vector<8x256xi1>, vector<8x256xf32>
    %122 = arith.addf %114, %121 : vector<8x256xf32>
    %123 = vector.extract_strided_slice %99 {offsets = [24, 0], sizes = [8, 256], strides = [1, 1]} : vector<72x256xf32> to vector<8x256xf32>
    %c1_i32_41 = arith.constant 1 : i32
    %124 = tpu.dynamic_rotate %123 by %c1_i32_41 dim 1 : vector<8x256xf32>, i32 -> vector<8x256xf32>
    %cst_42 = arith.constant 0.000000e+00 : f32
    %125 = vector.shape_cast %8 : vector<1x256xi1> to vector<1x256xi1>
    %126 = vector.broadcast %125 : vector<1x256xi1> to vector<8x256xi1>
    %127 = vector.broadcast %cst_42 : f32 to vector<8x256xf32>
    %128 = arith.select %126, %124, %127 : vector<8x256xi1>, vector<8x256xf32>
    %129 = arith.addf %122, %128 : vector<8x256xf32>
    %130 = vector.extract_strided_slice %99 {offsets = [32, 0], sizes = [8, 256], strides = [1, 1]} : vector<72x256xf32> to vector<8x256xf32>
    %131 = arith.addf %129, %130 : vector<8x256xf32>
    %132 = vector.extract_strided_slice %99 {offsets = [40, 0], sizes = [8, 256], strides = [1, 1]} : vector<72x256xf32> to vector<8x256xf32>
    %c255_i32_43 = arith.constant 255 : i32
    %133 = tpu.dynamic_rotate %132 by %c255_i32_43 dim 1 : vector<8x256xf32>, i32 -> vector<8x256xf32>
    %cst_44 = arith.constant 0.000000e+00 : f32
    %134 = vector.shape_cast %10 : vector<1x256xi1> to vector<1x256xi1>
    %135 = vector.broadcast %134 : vector<1x256xi1> to vector<8x256xi1>
    %136 = vector.broadcast %cst_44 : f32 to vector<8x256xf32>
    %137 = arith.select %135, %133, %136 : vector<8x256xi1>, vector<8x256xf32>
    %138 = arith.addf %131, %137 : vector<8x256xf32>
    %139 = vector.extract_strided_slice %99 {offsets = [48, 0], sizes = [8, 256], strides = [1, 1]} : vector<72x256xf32> to vector<8x256xf32>
    %c241_i32_45 = arith.constant 241 : i32
    %140 = tpu.dynamic_rotate %139 by %c241_i32_45 dim 1 : vector<8x256xf32>, i32 -> vector<8x256xf32>
    %141 = arith.andi %6, %8 : vector<1x256xi1>
    %cst_46 = arith.constant 0.000000e+00 : f32
    %142 = vector.shape_cast %141 : vector<1x256xi1> to vector<1x256xi1>
    %143 = vector.broadcast %142 : vector<1x256xi1> to vector<8x256xi1>
    %144 = vector.broadcast %cst_46 : f32 to vector<8x256xf32>
    %145 = arith.select %143, %140, %144 : vector<8x256xi1>, vector<8x256xf32>
    %146 = arith.addf %138, %145 : vector<8x256xf32>
    %147 = vector.extract_strided_slice %99 {offsets = [56, 0], sizes = [8, 256], strides = [1, 1]} : vector<72x256xf32> to vector<8x256xf32>
    %c240_i32_47 = arith.constant 240 : i32
    %148 = tpu.dynamic_rotate %147 by %c240_i32_47 dim 1 : vector<8x256xf32>, i32 -> vector<8x256xf32>
    %cst_48 = arith.constant 0.000000e+00 : f32
    %149 = vector.shape_cast %6 : vector<1x256xi1> to vector<1x256xi1>
    %150 = vector.broadcast %149 : vector<1x256xi1> to vector<8x256xi1>
    %151 = vector.broadcast %cst_48 : f32 to vector<8x256xf32>
    %152 = arith.select %150, %148, %151 : vector<8x256xi1>, vector<8x256xf32>
    %153 = arith.addf %146, %152 : vector<8x256xf32>
    %154 = vector.extract_strided_slice %99 {offsets = [64, 0], sizes = [8, 256], strides = [1, 1]} : vector<72x256xf32> to vector<8x256xf32>
    %c239_i32_49 = arith.constant 239 : i32
    %155 = tpu.dynamic_rotate %154 by %c239_i32_49 dim 1 : vector<8x256xf32>, i32 -> vector<8x256xf32>
    %156 = arith.andi %6, %10 : vector<1x256xi1>
    %cst_50 = arith.constant 0.000000e+00 : f32
    %157 = vector.shape_cast %156 : vector<1x256xi1> to vector<1x256xi1>
    %158 = vector.broadcast %157 : vector<1x256xi1> to vector<8x256xi1>
    %159 = vector.broadcast %cst_50 : f32 to vector<8x256xf32>
    %160 = arith.select %158, %155, %159 : vector<8x256xi1>, vector<8x256xf32>
    %161 = arith.addf %153, %160 : vector<8x256xf32>
    %162 = arith.negf %161 : vector<8x256xf32>
    %163 = math.exp %162 : vector<8x256xf32>
    %cst_51 = arith.constant 1.000000e+00 : f32
    %164 = vector.broadcast %cst_51 : f32 to vector<8x256xf32>
    %165 = arith.addf %164, %163 : vector<8x256xf32>
    %166 = arith.divf %164, %165 : vector<8x256xf32>
    %c1_52 = arith.constant 1 : index
    %c0_53 = arith.constant 0 : index
    %c0_54 = arith.constant 0 : index
    %167 = vector.load %arg6[%c1_52, %c0_53, %c0_54] : memref<2x8x256xf32, #tpu.memory_space<vmem>>, vector<1x8x256xf32>
    %168 = vector.shape_cast %167 : vector<1x8x256xf32> to vector<8x256xf32>
    %169 = vector.shape_cast %166 : vector<8x256xf32> to vector<1x8x256xf32>
    tpu.vector_store %arg6[%c1_52, %c0_53, %c0_54], %169 {strides = array<i32>} : memref<2x8x256xf32, #tpu.memory_space<vmem>>, vector<1x8x256xf32>,
    return
  }
  func.func @transform_0(%arg0: i32) -> (i32, i32, i32) {
    %c0_i32 = arith.constant 0 : i32
    %c0_i32_0 = arith.constant 0 : i32
    %c0_i32_1 = arith.constant 0 : i32
    %c0_i32_2 = arith.constant 0 : i32
    return %c0_i32, %c0_i32_0, %c0_i32_1 : i32, i32, i32
  }
  func.func @transform_1(%arg0: i32) -> (i32, i32, i32) {
    %c0_i32 = arith.constant 0 : i32
    %c0_i32_0 = arith.constant 0 : i32
    %c0_i32_1 = arith.constant 0 : i32
    %c0_i32_2 = arith.constant 0 : i32
    return %c0_i32, %c0_i32_0, %c0_i32_1 : i32, i32, i32
  }
  func.func @transform_2(%arg0: i32) -> (i32, i32) {
    %c0_i32 = arith.constant 0 : i32
    %c0_i32_0 = arith.constant 0 : i32
    %c0_i32_1 = arith.constant 0 : i32
    return %c0_i32, %c0_i32_0 : i32, i32
  }
  func.func @transform_3(%arg0: i32) -> (i32, i32) {
    %c0_i32 = arith.constant 0 : i32
    %c0_i32_0 = arith.constant 0 : i32
    %c0_i32_1 = arith.constant 0 : i32
    return %c0_i32, %c0_i32_0 : i32, i32
  }
  func.func @transform_4(%arg0: i32) -> (i32, i32) {
    %c0_i32 = arith.constant 0 : i32
    %c0_i32_0 = arith.constant 0 : i32
    %c0_i32_1 = arith.constant 0 : i32
    return %c0_i32, %c0_i32_0 : i32, i32
  }
  func.func @transform_5(%arg0: i32) -> (i32, i32, i32) {
    %c0_i32 = arith.constant 0 : i32
    %c0_i32_0 = arith.constant 0 : i32
    %c0_i32_1 = arith.constant 0 : i32
    %c0_i32_2 = arith.constant 0 : i32
    return %c0_i32, %c0_i32_0, %c0_i32_1 : i32, i32, i32
  }
}

</mosaic_0001>

<bundles_post_ra>
// kernel: tpu_custom_call.1
= control target key start
LH: loop header
LB: loop body
LE: loop exit
PB: predicated region body
PF: predicated region fallthrough
CT: control target
= control target key end

     0   :  { %10 = vsyncpa [#allocation3], 0  ;;  %s1520_s0 = inlined_call_operand.vmem [shape: f32[2,32,256], index: 0, kind: input, shape index: {}]   ;;  %s1521_s1 = inlined_call_operand.hbm [shape: f32[2,32,256], index: 1, kind: input, shape index: {}]   ;;  %s1522_s2 = inlined_call_operand.vmem [shape: f32[72,32], index: 2, kind: input, shape index: {}]   ;;  %s1523_s3 = inlined_call_operand.vmem [shape: f32[72,32], index: 3, kind: input, shape index: {}]   ;;  %s1524_s4 = inlined_call_operand.vmem [shape: f32[8,1], index: 4, kind: input, shape index: {}]   ;;  %s1525_s5 = inlined_call_operand.hbm [shape: f32[2,8,256], index: 5, kind: output, shape index: {}]  }
   0x1   :  { %11 = vsyncpa [#allocation4], 0  ;;  %s1029_s18 = smov [#allocation2]  }
   0x2   :  { %s19_s19 = sshll.u32 %s1029_s18, 4  ;;  %s20_s19 = int_to_ptr.vmem [resolvable:$true] %s19_s19 }
   0x3   :  { %s993_s20 = scalar_lea.vmem %s20_s19, 2048  ;;  %p998_p1 = scmp.lt.s32.totalorder %s20_s19, %s20_s19 }
   0x4   :  { %p994_p0 = scmp.ne.s32.totalorder %s20_s19, %s993_s20  ;;  %p999_p2 = scmp.lt.s32.totalorder %s993_s20, %s993_s20 }
   0x6   :  { %p1000_p3 = por %p999_p2, %p998_p1 }
   0x8   :  { %p1001_p4 = pnand %p1000_p3, %p994_p0 }
   0xa   :  { %1004 = shalt.err (!%p1001_p4)
}
   0xb   :  { %s1030_s21 = smov 256   ;;  %s1031_s22 = smov 16  }
   0xc   :  { %25 = dma.hbm_to_vmem [thread:$0]  %s1521_s1, 2048, %s20_s19, [#allocation3], %s1030_s21, %s1030_s21, %s1031_s22  }
   0xd   :  { %1025 = dma.done.wait [#allocation3], 2048  }
   0xe   :  { %1026 = vsyncadd [#allocation3], 4294965248  ;;  %v1032_v0 = vmov 0.0   ;;  %v1033_v1 = vmov 0   ;;  %v99_v2 = vld [vmem:[#allocation2 + $0x38] sm:$0xff]  ;;  %v98_v4 = vld [vmem:[#allocation2 + $0x30] sm:$0xff] }
   0xf   :  { %192 = vmatprep.mubr.f32.mxu0 %v1032_v0  ;;  %338 = vmatprep.mubr.f32.mxu1 %v1032_v0  ;;  %v91_v3 = vld [vmem:[%s1520_s0 + $0x38] sm:$0xff]  ;;  %v90_v5 = vld [vmem:[%s1520_s0 + $0x30] sm:$0xff]  ;;  %v97_v6 = vld [vmem:[#allocation2 + $0x28] sm:$0xff]  ;;  %vm100_vm0 = vcmask 261120   ;;  %s1036_s19 = smov 1   ;;  %s1037_s20 = smov 127  }
  0x10   :  { %968 = vset.pattern.permute.xlu0 %v1033_v1  ;;  %152 = vmatprep.subr.mxu0 %v99_v2  ;;  %v89_v7 = vld [vmem:[%s1520_s0 + $0x28] sm:$0xff]  ;;  %v96_v8 = vld [vmem:[#allocation2 + $0x20] sm:$0xff]  ;;  %v95_v10 = vld [vmem:[#allocation2 + $0x18] sm:$0xff]  ;;  %s1038_s23 = smov 113   ;;  %s1039_s24 = smov 112  }
  0x11   :  { %298 = vmatprep.subr.mxu1 %v91_v3  ;;  %153 = vmatpush1.msra.mxu0 %v98_v4  ;;  %v88_v9 = vld [vmem:[%s1520_s0 + $0x20] sm:$0xff]  ;;  %v87_v11 = vld [vmem:[%s1520_s0 + $0x18] sm:$0xff]  ;;  %v94_v12 = vld [vmem:[#allocation2 + $0x10] sm:$0xff]  ;;  %s1040_s25 = smov 111   ;;  %s1041_s26 = smov [#allocation5]  }
  0x12   :  { %299 = vmatpush1.msra.mxu1 %v90_v5  ;;  %154 = vmatprep.subr.mxu0 %v97_v6  ;;  %v86_v13 = vld [vmem:[%s1520_s0 + $0x10] sm:$0xff]  ;;  %v93_v14 = vld [vmem:[#allocation2 + $0x8] sm:$0xff]  ;;  %v92_v16 = vld [vmem:[#allocation2] sm:$0xff]  ;;  %s895_s27 = sshll.u32 %s1041_s26, 4  ;;  %s896_s27 = int_to_ptr.vmem [resolvable:$true] %s895_s27 }
  0x13   :  { %300 = vmatprep.subr.mxu1 %v89_v7  ;;  %155 = vmatpush1.msra.mxu0 %v96_v8  ;;  %v85_v15 = vld [vmem:[%s1520_s0 + $0x8] sm:$0xff]  ;;  %v84_v17 = vld [vmem:[%s1520_s0] sm:$0xff]  ;;  %v554_v20 = vld [vmem:[#allocation2 + $0x78] sm:$0xff]  ;;  %s1005_s28 = scalar_lea.vmem %s896_s27, 512  ;;  %p1010_p6 = scmp.lt.s32.totalorder %s896_s27, %s896_s27 }
  0x14   :  { %301 = vmatpush1.msra.mxu1 %v88_v9  ;;  %156 = vmatprep.subr.mxu0 %v95_v10  ;;  %v1107_v18 = vld [vmem:[%s1523_s3] sm:$0xff]  ;;  %v934_v21 = vld [vmem:[%s1520_s0 + $0x78] sm:$0xff]  ;;  %v553_v22 = vld [vmem:[#allocation2 + $0x70] sm:$0xff]  ;;  %p1006_p5 = scmp.ne.s32.totalorder %s896_s27, %s1005_s28  ;;  %p1011_p7 = scmp.lt.s32.totalorder %s1005_s28, %s1005_s28 }
  0x15   :  { %302 = vmatprep.subr.mxu1 %v87_v11  ;;  %157 = vmatpush1.msra.mxu0 %v94_v12  ;;  %v1112_v19 = vld [vmem:[%s1522_s2] sm:$0xff]  ;;  %v933_v23 = vld [vmem:[%s1520_s0 + $0x70] sm:$0xff]  ;;  %v1127_v24 = vld [vmem:[%s1523_s3 + $0x8] sm:$0xff] }
  0x16   :  { %303 = vmatpush1.msra.mxu1 %v86_v13  ;;  %158 = vmatprep.subr.mxu0 %v93_v14  ;;  %v1132_v25 = vld [vmem:[%s1522_s2 + $0x8] sm:$0xff]  ;;  %v551_v28 = vld [vmem:[#allocation2 + $0x60] sm:$0xff]  ;;  %v1151_v30 = vld [vmem:[%s1523_s3 + $0x10] sm:$0xff]  ;;  %p1012_p8 = por %p1011_p7, %p1010_p6 }
  0x17   :  { %304 = vmatprep.subr.mxu1 %v85_v15  ;;  %159 = vmatpush1.msra.mxu0 %v92_v16  ;;  %v552_v26 = vld [vmem:[#allocation2 + $0x68] sm:$0xff]  ;;  %v931_v29 = vld [vmem:[%s1520_s0 + $0x60] sm:$0xff]  ;;  %v1156_v31 = vld [vmem:[%s1522_s2 + $0x10] sm:$0xff] }
  0x18   :  { %305 = vmatpush1.msra.mxu1 %v84_v17  ;;  %907 = vmatmul.mubr.msk.f32.vlgmr.msra.gmra.mxu0 %vm100_vm0, %v1107_v18  ;;  %v932_v27 = vld [vmem:[%s1520_s0 + $0x68] sm:$0xff]  ;;  %v550_v32 = vld [vmem:[#allocation2 + $0x58] sm:$0xff]  ;;  %v549_v34 = vld [vmem:[#allocation2 + $0x50] sm:$0xff]  ;;  %p1013_p9 = pnand %p1012_p8, %p1006_p5 }
  0x19   :  { %916 = vmatmul.mubr.msk.f32.vlgmr.msra.gmra.mxu1 %vm100_vm0, %v1112_v19  ;;  %579 = vmatprep.subr.mxu0 %v554_v20  ;;  %v930_v33 = vld [vmem:[%s1520_s0 + $0x58] sm:$0xff]  ;;  %v929_v35 = vld [vmem:[%s1520_s0 + $0x50] sm:$0xff]  ;;  %v548_v38 = vld [vmem:[#allocation2 + $0x48] sm:$0xff] }
  0x1a   :  { %698 = vmatprep.subr.mxu1 %v934_v21  ;;  %580 = vmatpush1.msra.mxu0 %v553_v22  ;;  %v78_v36 = vld [vmem:[%s1523_s3 + $0x18] sm:$0xff]  ;;  %v928_v39 = vld [vmem:[%s1520_s0 + $0x48] sm:$0xff]  ;;  %v547_v40 = vld [vmem:[#allocation2 + $0x40] sm:$0xff] }
  0x1b   :  { %699 = vmatpush1.msra.mxu1 %v933_v23  ;;  %198 = vmatprep.mubr.f32.mxu0 %v1032_v0  ;;  %v69_v37 = vld [vmem:[%s1522_s2 + $0x18] sm:$0xff]  ;;  %v927_v41 = vld [vmem:[%s1520_s0 + $0x40] sm:$0xff]  ;;  %v80_v45 = vld [vmem:[%s1523_s3 + $0x28] sm:$0xff] }
  0x1c   :  { %344 = vmatprep.mubr.f32.mxu1 %v1032_v0  ;;  %908 = vmatmul.mubr.msk.f32.gmra.mxu0 %vm100_vm0, %v1127_v24  ;;  %v79_v42 = vld [vmem:[%s1523_s3 + $0x20] sm:$0xff]  ;;  %v71_v46 = vld [vmem:[%s1522_s2 + $0x28] sm:$0xff]  ;;  %v81_v47 = vld [vmem:[%s1523_s3 + $0x30] sm:$0xff] }
  0x1d   :  { %917 = vmatmul.mubr.msk.f32.gmra.mxu1 %vm100_vm0, %v1132_v25  ;;  %204 = vmatprep.mubr.f32.mxu0 %v1032_v0  ;;  %v70_v43 = vld [vmem:[%s1522_s2 + $0x20] sm:$0xff]  ;;  %v72_v48 = vld [vmem:[%s1522_s2 + $0x30] sm:$0xff]  ;;  %v82_v49 = vld [vmem:[%s1523_s3 + $0x38] sm:$0xff] }
  0x1e   :  { %350 = vmatprep.mubr.f32.mxu1 %v1032_v0  ;;  %581 = vmatprep.subr.mxu0 %v552_v26  ;;  %v60_v44 = vld [vmem:[%s1524_s4] sm:$0xff]  ;;  %v73_v50 = vld [vmem:[%s1522_s2 + $0x38] sm:$0xff] }
  0x1f   :  { %700 = vmatprep.subr.mxu1 %v932_v27  ;;  %582 = vmatpush1.msra.mxu0 %v551_v28  ;;  %v83_v51 = vld [vmem:[%s1523_s3 + $0x40] sm:$0xff]  ;;  %s1035_s3 = smov 15  }
  0x20   :  { %701 = vmatpush1.msra.mxu1 %v931_v29  ;;  %909 = vmatmul.mubr.msk.f32.gmra.mxu0 %vm100_vm0, %v1151_v30  ;;  %v74_v52 = vld [vmem:[%s1522_s2 + $0x40] sm:$0xff]  ;;  %s1034_s2 = smov 17  }
  0x21   :  { %918 = vmatmul.mubr.msk.f32.gmra.mxu1 %vm100_vm0, %v1156_v31  ;;  %210 = vmatprep.mubr.f32.mxu0 %v1032_v0 }
  0x22   :  { %356 = vmatprep.mubr.f32.mxu1 %v1032_v0  ;;  %583 = vmatprep.subr.mxu0 %v550_v32 }
  0x23   :  { %702 = vmatprep.subr.mxu1 %v930_v33  ;;  %584 = vmatpush1.msra.mxu0 %v549_v34 }
  0x24   :  { %703 = vmatpush1.msra.mxu1 %v929_v35  ;;  %910 = vmatmul.mubr.msk.f32.gmra.mxu0 %vm100_vm0, %v78_v36 }
  0x25   :  { %919 = vmatmul.mubr.msk.f32.gmra.mxu1 %vm100_vm0, %v69_v37  ;;  %216 = vmatprep.mubr.f32.mxu0 %v1032_v0 }
  0x26   :  { %362 = vmatprep.mubr.f32.mxu1 %v1032_v0  ;;  %585 = vmatprep.subr.mxu0 %v548_v38 }
  0x27   :  { %704 = vmatprep.subr.mxu1 %v928_v39  ;;  %586 = vmatpush1.msra.mxu0 %v547_v40 }
  0x28   :  { %705 = vmatpush1.msra.mxu1 %v927_v41  ;;  %911 = vmatmul.mubr.msk.f32.gmra.mxu0 %vm100_vm0, %v79_v42 }
  0x29   :  { %920 = vmatmul.mubr.msk.f32.gmra.mxu1 %vm100_vm0, %v70_v43  ;;  %222 = vmatprep.mubr.f32.mxu0 %v1032_v0 }
  0x2a   :  { %368 = vmatprep.mubr.f32.mxu1 %v1032_v0  ;;  %63 = vperm.xlu0 %968, %v60_v44  }
  0x2c   :  { %912 = vmatmul.mubr.msk.f32.gmra.mxu0 %vm100_vm0, %v80_v45 }
  0x2d   :  { %921 = vmatmul.mubr.msk.f32.gmra.mxu1 %vm100_vm0, %v71_v46  ;;  %228 = vmatprep.mubr.f32.mxu0 %v1032_v0 }
  0x2e   :  { %374 = vmatprep.mubr.f32.mxu1 %v1032_v0 }
  0x30   :  { %913 = vmatmul.mubr.msk.f32.gmra.mxu0 %vm100_vm0, %v81_v47 }
  0x31   :  { %922 = vmatmul.mubr.msk.f32.gmra.mxu1 %vm100_vm0, %v72_v48  ;;  %234 = vmatprep.mubr.f32.mxu0 %v1032_v0 }
  0x32   :  { %380 = vmatprep.mubr.f32.mxu1 %v1032_v0 }
  0x34   :  { %914 = vmatmul.mubr.msk.f32.gmra.mxu0 %vm100_vm0, %v82_v49 }
  0x35   :  { %923 = vmatmul.mubr.msk.f32.gmra.mxu1 %vm100_vm0, %v73_v50  ;;  %240 = vmatprep.mubr.f32.mxu0 %v1032_v0 }
  0x36   :  { %386 = vmatprep.mubr.f32.mxu1 %v1032_v0 }
  0x38   :  { %915 = vmatmul.mubr.msk.f32.gmra.mxu0 %vm100_vm0, %v83_v51 }
  0x39   :  { %924 = vmatmul.mubr.msk.f32.gmra.mxu1 %vm100_vm0, %v74_v52  ;;  %619 = vmatprep.mubr.f32.mxu0 %v1032_v0 }
  0x3a   :  { %738 = vmatprep.mubr.f32.mxu1 %v1032_v0 }
  0x3c   :  { %935 = vmatmul.mubr.msk.f32.vlgmr.msra.gmra.mxu0 %vm100_vm0, %v1107_v18 }
  0x3d   :  { %944 = vmatmul.mubr.msk.f32.vlgmr.msra.gmra.mxu1 %vm100_vm0, %v1112_v19  ;;  %625 = vmatprep.mubr.f32.mxu0 %v1032_v0 }
  0x3e   :  { %744 = vmatprep.mubr.f32.mxu1 %v1032_v0 }
  0x40   :  { %936 = vmatmul.mubr.msk.f32.gmra.mxu0 %vm100_vm0, %v1127_v24 }
  0x41   :  { %945 = vmatmul.mubr.msk.f32.gmra.mxu1 %vm100_vm0, %v1132_v25  ;;  %631 = vmatprep.mubr.f32.mxu0 %v1032_v0 }
  0x42   :  { %750 = vmatprep.mubr.f32.mxu1 %v1032_v0 }
  0x44   :  { %937 = vmatmul.mubr.msk.f32.gmra.mxu0 %vm100_vm0, %v1151_v30 }
  0x45   :  { %946 = vmatmul.mubr.msk.f32.gmra.mxu1 %vm100_vm0, %v1156_v31  ;;  %637 = vmatprep.mubr.f32.mxu0 %v1032_v0 }
  0x46   :  { %756 = vmatprep.mubr.f32.mxu1 %v1032_v0 }
  0x48   :  { %938 = vmatmul.mubr.msk.f32.gmra.mxu0 %vm100_vm0, %v78_v36 }
  0x49   :  { %947 = vmatmul.mubr.msk.f32.gmra.mxu1 %vm100_vm0, %v69_v37  ;;  %643 = vmatprep.mubr.f32.mxu0 %v1032_v0 }
  0x4a   :  { %762 = vmatprep.mubr.f32.mxu1 %v1032_v0 }
  0x4c   :  { %939 = vmatmul.mubr.msk.f32.gmra.mxu0 %vm100_vm0, %v79_v42 }
  0x4d   :  { %948 = vmatmul.mubr.msk.f32.gmra.mxu1 %vm100_vm0, %v70_v43  ;;  %649 = vmatprep.mubr.f32.mxu0 %v1032_v0 }
  0x4e   :  { %768 = vmatprep.mubr.f32.mxu1 %v1032_v0 }
  0x50   :  { %940 = vmatmul.mubr.msk.f32.gmra.mxu0 %vm100_vm0, %v80_v45 }
  0x51   :  { %949 = vmatmul.mubr.msk.f32.gmra.mxu1 %vm100_vm0, %v71_v46  ;;  %655 = vmatprep.mubr.f32.mxu0 %v1032_v0 }
  0x52   :  { %774 = vmatprep.mubr.f32.mxu1 %v1032_v0 }
  0x54   :  { %941 = vmatmul.mubr.msk.f32.gmra.mxu0 %vm100_vm0, %v81_v47 }
  0x55   :  { %950 = vmatmul.mubr.msk.f32.gmra.mxu1 %vm100_vm0, %v72_v48  ;;  %661 = vmatprep.mubr.f32.mxu0 %v1032_v0 }
  0x56   :  { %780 = vmatprep.mubr.f32.mxu1 %v1032_v0 }
  0x58   :  { %942 = vmatmul.mubr.msk.f32.gmra.mxu0 %vm100_vm0, %v82_v49 }
  0x59   :  { %951 = vmatmul.mubr.msk.f32.gmra.mxu1 %vm100_vm0, %v73_v50  ;;  %667 = vmatprep.mubr.f32.mxu0 %v1032_v0 }
  0x5a   :  { %786 = vmatprep.mubr.f32.mxu1 %v1032_v0 }
  0x5c   :  { %943 = vmatmul.mubr.msk.f32.gmra.mxu0 %vm100_vm0, %v83_v51 }
  0x5d   :  { %952 = vmatmul.mubr.msk.f32.gmra.mxu1 %vm100_vm0, %v74_v52 }
  0xd8   :  { %v194_v53 = vpop.f32.mrf.mxu0 }
  0xd9   :  { %v340_v54 = vpop.f32.mrf.mxu1 }
  0xda   :  { %v341_v55 = vadd.f32 %v340_v54, %v194_v53  ;;  %v196_v56 = vpop.f32.mrf.mxu0 }
  0xdb   :  { %v342_v57 = vpop.f32.mrf.mxu1 }
  0xdc   :  { %v343_v58 = vadd.f32 %v342_v57, %v196_v56  ;;  %393 = vrot.lane.b32.xlu0 %v341_v55, %s1034_s2  ;;  %v200_v59 = vpop.f32.mrf.mxu0 }
  0xdd   :  { %v346_v60 = vpop.f32.mrf.mxu1 }
  0xde   :  { %395 = vrot.lane.b32.xlu1 %v343_v58, %s1034_s2  ;;  %v202_v61 = vpop.f32.mrf.mxu0  ;;  %v347_v63 = vadd.f32 %v346_v60, %v200_v59 }
  0xdf   :  { %v348_v62 = vpop.f32.mrf.mxu1 }
  0xe0   :  { %v349_v0 = vadd.f32 %v348_v62, %v202_v61  ;;  %v206_v1 = vpop.f32.mrf.mxu0 }
  0xe1   :  { %v352_v2 = vpop.f32.mrf.mxu1 }
  0xe2   :  { %410 = vrot.lane.b32.xlu1 %v347_v63, %s1031_s22  ;;  %412 = vrot.lane.b32.xlu0 %v349_v0, %s1031_s22  ;;  %v208_v3 = vpop.f32.mrf.mxu0  ;;  %v353_v5 = vadd.f32 %v352_v2, %v206_v1 }
  0xe3   :  { %v354_v4 = vpop.f32.mrf.mxu1 }
  0xe4   :  { %v355_v6 = vadd.f32 %v354_v4, %v208_v3  ;;  %v212_v7 = vpop.f32.mrf.mxu0 }
  0xe5   :  { %v358_v8 = vpop.f32.mrf.mxu1 }
  0xe6   :  { %425 = vrot.lane.b32.xlu1 %v353_v5, %s1035_s3  ;;  %427 = vrot.lane.b32.xlu0 %v355_v6, %s1035_s3  ;;  %v214_v9 = vpop.f32.mrf.mxu0  ;;  %v359_v11 = vadd.f32 %v358_v8, %v212_v7 }
  0xe7   :  { %v360_v10 = vpop.f32.mrf.mxu1 }
  0xe8   :  { %v361_v12 = vadd.f32 %v360_v10, %v214_v9  ;;  %v218_v13 = vpop.f32.mrf.mxu0 }
  0xe9   :  { %v364_v14 = vpop.f32.mrf.mxu1 }
  0xea   :  { %v1285_v15 = vadd.f32 %v364_v14, %v218_v13  ;;  %442 = vrot.lane.b32.xlu1 %v359_v11, %s1036_s19  ;;  %444 = vrot.lane.b32.xlu0 %v361_v12, %s1036_s19  ;;  %v220_v16 = vpop.f32.mrf.mxu0 }
  0xeb   :  { %v366_v17 = vpop.f32.mrf.mxu1 }
  0xec   :  { %v1289_v18 = vadd.f32 %v366_v17, %v220_v16  ;;  %v224_v19 = vpop.f32.mrf.mxu0 }
  0xed   :  { %v370_v20 = vpop.f32.mrf.mxu1 }
  0xee   :  { %v371_v21 = vadd.f32 %v370_v20, %v224_v19  ;;  %v226_v22 = vpop.f32.mrf.mxu0 }
  0xef   :  { %v372_v23 = vpop.f32.mrf.mxu1 }
  0xf0   :  { %v373_v24 = vadd.f32 %v372_v23, %v226_v22  ;;  %459 = vrot.lane.b32.xlu1 %v371_v21, %s1037_s20  ;;  %v230_v25 = vpop.f32.mrf.mxu0 }
  0xf1   :  { %v376_v26 = vpop.f32.mrf.mxu1 }
  0xf2   :  { %v377_v27 = vadd.f32 %v376_v26, %v230_v25  ;;  %461 = vrot.lane.b32.xlu0 %v373_v24, %s1037_s20  ;;  %v232_v28 = vpop.f32.mrf.mxu0 }
  0xf3   :  { %v378_v29 = vpop.f32.mrf.mxu1 }
  0xf4   :  { %v379_v30 = vadd.f32 %v378_v29, %v232_v28  ;;  %474 = vrot.lane.b32.xlu1 %v377_v27, %s1038_s23  ;;  %v236_v31 = vpop.f32.mrf.mxu0 }
  0xf5   :  { %v382_v32 = vpop.f32.mrf.mxu1 }
  0xf6   :  { %v383_v33 = vadd.f32 %v382_v32, %v236_v31  ;;  %476 = vrot.lane.b32.xlu0 %v379_v30, %s1038_s23  ;;  %v238_v34 = vpop.f32.mrf.mxu0 }
  0xf7   :  { %v384_v35 = vpop.f32.mrf.mxu1 }
  0xf8   :  { %v385_v36 = vadd.f32 %v384_v35, %v238_v34  ;;  %491 = vrot.lane.b32.xlu1 %v383_v33, %s1039_s24  ;;  %v242_v37 = vpop.f32.mrf.mxu0  ;;  %v35_v35 = vlaneseq }
  0xf9   :  { %v388_v38 = vpop.f32.mrf.mxu1 }
  0xfa   :  { %v389_v39 = vadd.f32 %v388_v38, %v242_v37  ;;  %493 = vrot.lane.b32.xlu0 %v385_v36, %s1039_s24  ;;  %v244_v40 = vpop.f32.mrf.mxu0  ;;  %v1319_v36 = vpop.permute.xlu0 %63  ;;  %v1321_v37 = vand.u32 127, %v35_v35 }
  0xfb   :  { %v390_v41 = vpop.f32.mrf.mxu1 }
  0xfc   :  { %v391_v42 = vadd.f32 %v390_v41, %v244_v40  ;;  %506 = vrot.lane.b32.xlu1 %v389_v39, %s1040_s25  ;;  %v621_v43 = vpop.f32.mrf.mxu0  ;;  %v1324_v40 = vadd.s32 128, %v1321_v37  ;;  %v42_v41 = vand.u32 15, %v1321_v37  ;;  %vm52_vm1 = vcmp.ge.s32.totalorder %v1321_v37, 16 }
  0xfd   :  { %v740_v44 = vpop.f32.mrf.mxu1  ;;  %vm397_vm3 = vcmp.lt.s32.totalorder %v1321_v37, 17  ;;  %vm414_vm4 = vcmp.lt.s32.totalorder %v1321_v37, 16  ;;  %vm429_vm8 = vcmp.lt.s32.totalorder %v1321_v37, 15  ;;  %vm446_vm9 = vcmp.lt.s32.totalorder %v1321_v37, 1 }
  0xfe   :  { %v741_v45 = vadd.f32 %v740_v44, %v621_v43  ;;  %508 = vrot.lane.b32.xlu0 %v391_v42, %s1040_s25  ;;  %v623_v46 = vpop.f32.mrf.mxu0  ;;  %v49_v44 = vand.u32 15, %v1324_v40  ;;  %vm1329_vm2 = vcmp.ge.s32.totalorder %v42_v41, 1  ;;  %vm1351_vm7 = vcmp.le.s32.totalorder %v42_v41, 14 }
  0xff   :  { %v742_v47 = vpop.f32.mrf.mxu1  ;;  %vm1343_vm6 = vmand %vm52_vm1, %vm1329_vm2  ;;  %vm1527_vm12 = vcmp.lt.s32.totalorder %v1321_v37, 127  ;;  %vm55_vm13 = vcmp.lt.s32.totalorder %v1324_v40, 240  ;;  %vm1526_vm14 = vcmp.lt.s32.totalorder %v1321_v37, 113  ;;  %vm495_vm0 = vcmp.lt.s32.totalorder %v1321_v37, 112 }
 0x100   :  { %v743_v48 = vadd.f32 %v742_v47, %v623_v46  ;;  %793 = vrot.lane.b32.xlu1 %v741_v45, %s1034_s2  ;;  %v627_v49 = vpop.f32.mrf.mxu0  ;;  %vm1335_vm5 = vcmp.ge.s32.totalorder %v49_v44, 1  ;;  %vm1367_vm10 = vmand %vm52_vm1, %vm1351_vm7  ;;  %vm1375_vm11 = vcmp.le.s32.totalorder %v49_v44, 14 }
 0x101   :  { %v746_v50 = vpop.f32.mrf.mxu1  ;;  %vm1411_vm15 = vmand %vm55_vm13, %vm1335_vm5 }
 0x102   :  { %v747_v51 = vadd.f32 %v746_v50, %v627_v49  ;;  %795 = vrot.lane.b32.xlu0 %v743_v48, %s1034_s2  ;;  %v629_v52 = vpop.f32.mrf.mxu0 }
 0x103   :  { %v748_v53 = vpop.f32.mrf.mxu1 }
 0x104   :  { %v749_v54 = vadd.f32 %v748_v53, %v629_v52  ;;  %803 = vrot.lane.b32.xlu1 %v747_v51, %s1031_s22  ;;  %v633_v55 = vpop.f32.mrf.mxu0 }
 0x105   :  { %v752_v56 = vpop.f32.mrf.mxu1 }
 0x106   :  { %v753_v57 = vadd.f32 %v752_v56, %v633_v55  ;;  %805 = vrot.lane.b32.xlu0 %v749_v54, %s1031_s22  ;;  %v635_v58 = vpop.f32.mrf.mxu0 }
 0x107   :  { %v754_v59 = vpop.f32.mrf.mxu1 }
 0x108   :  { %v755_v60 = vadd.f32 %v754_v59, %v635_v58  ;;  %813 = vrot.lane.b32.xlu1 %v753_v57, %s1035_s3  ;;  %v639_v61 = vpop.f32.mrf.mxu0 }
 0x109   :  { %v758_v62 = vpop.f32.mrf.mxu1 }
 0x10a   :  { %v759_v63 = vadd.f32 %v758_v62, %v639_v61  ;;  %815 = vrot.lane.b32.xlu0 %v755_v60, %s1035_s3  ;;  %v641_v0 = vpop.f32.mrf.mxu0 }
 0x10b   :  { %v760_v1 = vpop.f32.mrf.mxu1 }
 0x10c   :  { %v761_v2 = vadd.f32 %v760_v1, %v641_v0  ;;  %823 = vrot.lane.b32.xlu1 %v759_v63, %s1036_s19  ;;  %v645_v3 = vpop.f32.mrf.mxu0 }
 0x10d   :  { %v764_v4 = vpop.f32.mrf.mxu1 }
 0x10e   :  { %v1306_v5 = vadd.f32 %v764_v4, %v645_v3  ;;  %825 = vrot.lane.b32.xlu0 %v761_v2, %s1036_s19  ;;  %v647_v6 = vpop.f32.mrf.mxu0 }
 0x10f   :  { %v766_v7 = vpop.f32.mrf.mxu1 }
 0x110   :  { %v1309_v8 = vadd.f32 %v766_v7, %v647_v6  ;;  %v651_v9 = vpop.f32.mrf.mxu0 }
 0x111   :  { %v770_v10 = vpop.f32.mrf.mxu1 }
 0x112   :  { %v771_v11 = vadd.f32 %v770_v10, %v651_v9  ;;  %v653_v12 = vpop.f32.mrf.mxu0 }
 0x113   :  { %v772_v13 = vpop.f32.mrf.mxu1 }
 0x114   :  { %v773_v14 = vadd.f32 %v772_v13, %v653_v12  ;;  %835 = vrot.lane.b32.xlu1 %v771_v11, %s1037_s20  ;;  %v657_v16 = vpop.f32.mrf.mxu0 }
 0x115   :  { %v776_v17 = vpop.f32.mrf.mxu1 }
 0x116   :  { %v777_v19 = vadd.f32 %v776_v17, %v657_v16  ;;  %837 = vrot.lane.b32.xlu0 %v773_v14, %s1037_s20  ;;  %v659_v20 = vpop.f32.mrf.mxu0 }
 0x117   :  { %v778_v21 = vpop.f32.mrf.mxu1 }
 0x118   :  { %v779_v22 = vadd.f32 %v778_v21, %v659_v20  ;;  %845 = vrot.lane.b32.xlu1 %v777_v19, %s1038_s23  ;;  %v663_v23 = vpop.f32.mrf.mxu0 }
 0x119   :  { %v782_v24 = vpop.f32.mrf.mxu1 }
 0x11a   :  { %v783_v25 = vadd.f32 %v782_v24, %v663_v23  ;;  %847 = vrot.lane.b32.xlu0 %v779_v22, %s1038_s23  ;;  %v665_v26 = vpop.f32.mrf.mxu0 }
 0x11b   :  { %v784_v27 = vpop.f32.mrf.mxu1 }
 0x11c   :  { %v785_v28 = vadd.f32 %v784_v27, %v665_v26  ;;  %855 = vrot.lane.b32.xlu1 %v783_v25, %s1039_s24  ;;  %v669_v29 = vpop.f32.mrf.mxu0 }
 0x11d   :  { %v788_v30 = vpop.f32.mrf.mxu1 }
 0x11e   :  { %v789_v31 = vadd.f32 %v788_v30, %v669_v29  ;;  %857 = vrot.lane.b32.xlu0 %v785_v28, %s1039_s24  ;;  %v671_v32 = vpop.f32.mrf.mxu0 }
 0x11f   :  { %v790_v33 = vpop.f32.mrf.mxu1 }
 0x120   :  { %v791_v34 = vadd.f32 %v790_v33, %v671_v32  ;;  %865 = vrot.lane.b32.xlu1 %v789_v31, %s1040_s25 }
 0x122   :  { %867 = vrot.lane.b32.xlu0 %v791_v34, %s1040_s25 }
 0x14e   :  { %v394_v38 = vpop.permute.xlu0 %393 }
 0x150   :  { %v396_v39 = vpop.permute.xlu1 %395 }
 0x151   :  { %v398_v50 = vsel %vm397_vm3, %v394_v38, %v396_v39  ;;  %v399_v51 = vsel %vm397_vm3, %v396_v39, %v394_v38 }
 0x152   :  { %v406_v54 = vsel %vm1343_vm6, %v399_v51, 0.0  ;;  %v407_v55 = vsel %vm1335_vm5, %v398_v50, 0.0 }
 0x153   :  { %v408_v62 = vadd.f32 %v406_v54, %v1319_v36  ;;  %v409_v63 = vadd.f32 %v407_v55, %v1319_v36 }
 0x154   :  { %v411_v42 = vpop.permute.xlu1 %410  ;;  %v413_v43 = vpop.permute.xlu0 %412 }
 0x155   :  { %v416_v53 = vsel %vm414_vm4, %v413_v43, %v411_v42  ;;  %v415_v2 = vsel %vm414_vm4, %v411_v42, %v413_v43 }
 0x156   :  { %v421_v60 = vsel %vm52_vm1, %v416_v53, 0.0  ;;  %v424_v11 = vadd.f32 %v415_v2, %v409_v63 }
 0x157   :  { %v423_v4 = vadd.f32 %v421_v60, %v408_v62 }
 0x158   :  { %v426_v46 = vpop.permute.xlu1 %425  ;;  %v428_v47 = vpop.permute.xlu0 %427 }
 0x159   :  { %v431_v59 = vsel %vm429_vm8, %v428_v47, %v426_v46  ;;  %v430_v0 = vsel %vm429_vm8, %v426_v46, %v428_v47 }
 0x15a   :  { %v438_v3 = vsel %vm1367_vm10, %v431_v59, 0.0  ;;  %v439_v7 = vsel %vm1375_vm11, %v430_v0, 0.0 }
 0x15b   :  { %v440_v12 = vadd.f32 %v438_v3, %v423_v4  ;;  %v441_v16 = vadd.f32 %v439_v7, %v424_v11 }
 0x15c   :  { %v443_v56 = vpop.permute.xlu1 %442  ;;  %v445_v57 = vpop.permute.xlu0 %444 }
 0x15d   :  { %v448_v1 = vsel %vm446_vm9, %v445_v57, %v443_v56  ;;  %v447_v6 = vsel %vm446_vm9, %v443_v56, %v445_v57 }
 0x15e   :  { %v453_v9 = vsel %vm1329_vm2, %v448_v1, 0.0  ;;  %v454_v13 = vsel %vm1335_vm5, %v447_v6, 0.0 }
 0x15f   :  { %v455_v17 = vadd.f32 %v453_v9, %v440_v12  ;;  %v456_v21 = vadd.f32 %v454_v13, %v441_v16 }
 0x161   :  { %v457_v25 = vadd.f32 %v455_v17, %v1285_v15  ;;  %v458_v31 = vadd.f32 %v456_v21, %v1289_v18 }
 0x162   :  { %v460_v10 = vpop.permute.xlu1 %459 }
 0x164   :  { %v462_v14 = vpop.permute.xlu0 %461 }
 0x165   :  { %v464_v19 = vsel %vm1527_vm12, %v460_v10, %v462_v14  ;;  %v465_v22 = vsel %vm1527_vm12, %v462_v14, %v460_v10  ;;  %vm1438_vm12 = vmand %vm55_vm13, %vm1375_vm11 }
 0x166   :  { %v475_v20 = vpop.permute.xlu1 %474  ;;  %v470_v23 = vsel %vm1351_vm7, %v464_v19, 0.0  ;;  %v471_v29 = vsel %vm1375_vm11, %v465_v22, 0.0 }
 0x167   :  { %v472_v32 = vadd.f32 %v470_v23, %v457_v25  ;;  %v473_v35 = vadd.f32 %v471_v29, %v458_v31 }
 0x168   :  { %v477_v24 = vpop.permute.xlu0 %476 }
 0x169   :  { %v479_v27 = vsel %vm1526_vm14, %v475_v20, %v477_v24  ;;  %v480_v28 = vsel %vm1526_vm14, %v477_v24, %v475_v20  ;;  %vm510_vm14 = vcmp.lt.s32.totalorder %v1321_v37, 111 }
 0x16a   :  { %v487_v15 = vsel %vm1329_vm2, %v479_v27, 0.0  ;;  %v492_v30 = vpop.permute.xlu1 %491  ;;  %v488_v33 = vsel %vm1411_vm15, %v480_v28, 0.0 }
 0x16b   :  { %v489_v38 = vadd.f32 %v487_v15, %v472_v32  ;;  %v490_v18 = vadd.f32 %v488_v33, %v473_v35 }
 0x16c   :  { %v494_v34 = vpop.permute.xlu0 %493 }
 0x16d   :  { %v497_v39 = vsel %vm495_vm0, %v494_v34, %v492_v30  ;;  %v496_v41 = vsel %vm495_vm0, %v492_v30, %v494_v34 }
 0x16e   :  { %v503_v42 = vsel %vm55_vm13, %v497_v39, 0.0  ;;  %v507_v43 = vpop.permute.xlu1 %506  ;;  %v504_v47 = vadd.f32 %v496_v41, %v489_v38 }
 0x16f   :  { %v505_v50 = vadd.f32 %v503_v42, %v490_v18 }
 0x170   :  { %v509_v46 = vpop.permute.xlu0 %508 }
 0x171   :  { %v511_v51 = vsel %vm510_vm14, %v507_v43, %v509_v46  ;;  %v512_v53 = vsel %vm510_vm14, %v509_v46, %v507_v43 }
 0x172   :  { %v519_v54 = vsel %vm1351_vm7, %v511_v51, 0.0  ;;  %v520_v55 = vsel %vm1438_vm12, %v512_v53, 0.0  ;;  %v794_v56 = vpop.permute.xlu1 %793 }
 0x173   :  { %v521_v57 = vadd.f32 %v519_v54, %v504_v47  ;;  %v522_v59 = vadd.f32 %v520_v55, %v505_v50 }
 0x174   :  { %v796_v60 = vpop.permute.xlu0 %795 }
 0x175   :  { %v925_v62 = vmul.f32 -1.442695, %v521_v57  ;;  %v926_v63 = vmul.f32 -1.442695, %v522_v59  ;;  %v797_v4 = vsel %vm397_vm3, %v794_v56, %v796_v60  ;;  %v798_v6 = vsel %vm397_vm3, %v796_v60, %v794_v56 }
 0x176   :  { %v804_v0 = vpop.permute.xlu1 %803  ;;  %v799_v9 = vsel %vm1343_vm6, %v798_v6, 0.0  ;;  %v800_v10 = vsel %vm1335_vm5, %v797_v4, 0.0 }
 0x177   :  { %969 = vpow2.f32 %v925_v62  ;;  %v801_v16 = vadd.f32 %v799_v9, %v1319_v36  ;;  %v802_v17 = vadd.f32 %v800_v10, %v1319_v36 }
 0x178   :  { %971 = vpow2.f32 %v926_v63  ;;  %v806_v1 = vpop.permute.xlu0 %805 }
 0x179   :  { %v808_v7 = vsel %vm414_vm4, %v806_v1, %v804_v0  ;;  %v807_v21 = vsel %vm414_vm4, %v804_v0, %v806_v1  ;;  %vm1546_vm4 = vcmp.lt.s32.totalorder %v1321_v37, 113 }
 0x17a   :  { %v814_v2 = vpop.permute.xlu1 %813  ;;  %v809_v13 = vsel %vm52_vm1, %v808_v7, 0.0  ;;  %v812_v30 = vadd.f32 %v807_v21, %v802_v17  ;;  %vm1544_vm1 = vcmp.lt.s32.totalorder %v1321_v37, 127 }
 0x17b   :  { %v811_v25 = vadd.f32 %v809_v13, %v801_v16  ;;  %vm1545_vm3 = vmmov %vm1544_vm1 }
 0x17c   :  { %v816_v3 = vpop.permute.xlu0 %815 }
 0x17d   :  { %v818_v12 = vsel %vm429_vm8, %v816_v3, %v814_v2  ;;  %v817_v19 = vsel %vm429_vm8, %v814_v2, %v816_v3 }
 0x17e   :  { %v824_v14 = vpop.permute.xlu1 %823  ;;  %v819_v22 = vsel %vm1367_vm10, %v818_v12, 0.0  ;;  %v820_v28 = vsel %vm1375_vm11, %v817_v19, 0.0 }
 0x17f   :  { %v821_v31 = vadd.f32 %v819_v22, %v811_v25  ;;  %v822_v33 = vadd.f32 %v820_v28, %v812_v30 }
 0x180   :  { %v826_v11 = vpop.permute.xlu0 %825 }
 0x181   :  { %v828_v49 = vsel %vm446_vm9, %v826_v11, %v824_v14  ;;  %v827_v27 = vsel %vm446_vm9, %v824_v14, %v826_v11 }
 0x182   :  { %v829_v29 = vsel %vm1329_vm2, %v828_v49, 0.0  ;;  %v830_v58 = vsel %vm1335_vm5, %v827_v27, 0.0  ;;  %vm1547_vm5 = vmmov %vm1546_vm4 }
 0x183   :  { %v831_v34 = vadd.f32 %v829_v29, %v821_v31  ;;  %v832_v39 = vadd.f32 %v830_v58, %v822_v33 }
 0x184   :  { %v970_v20 = vpop.eup %969 }
 0x185   :  { %v972_v23 = vpop.eup %971  ;;  %v529_v24 = vadd.f32 1.0, %v970_v20  ;;  %v833_v18 = vadd.f32 %v831_v34, %v1306_v5  ;;  %v834_v53 = vadd.f32 %v832_v39, %v1309_v8 }
 0x186   :  { %v530_v36 = vadd.f32 1.0, %v972_v23  ;;  %v836_v15 = vpop.permute.xlu1 %835 }
 0x187   :  { %973 = vrcp.f32 %v529_v24 }
 0x188   :  { %975 = vrcp.f32 %v530_v36  ;;  %v838_v32 = vpop.permute.xlu0 %837 }
 0x189   :  { %v839_v35 = vsel %vm1544_vm1, %v836_v15, %v838_v32  ;;  %v840_v41 = vsel %vm1545_vm3, %v838_v32, %v836_v15 }
 0x18a   :  { %v846_v38 = vpop.permute.xlu1 %845  ;;  %v841_v42 = vsel %vm1351_vm7, %v839_v35, 0.0  ;;  %v842_v47 = vsel %vm1375_vm11, %v840_v41, 0.0 }
 0x18b   :  { %v843_v54 = vadd.f32 %v841_v42, %v833_v18  ;;  %v844_v56 = vadd.f32 %v842_v47, %v834_v53 }
 0x18c   :  { %v848_v43 = vpop.permute.xlu0 %847 }
 0x18d   :  { %v849_v48 = vsel %vm1546_vm4, %v846_v38, %v848_v43  ;;  %v850_v46 = vsel %vm1547_vm5, %v848_v43, %v846_v38 }
 0x18e   :  { %v851_v50 = vsel %vm1329_vm2, %v849_v48, 0.0  ;;  %v856_v51 = vpop.permute.xlu1 %855  ;;  %v852_v55 = vsel %vm1411_vm15, %v850_v46, 0.0 }
 0x18f   :  { %v853_v57 = vadd.f32 %v851_v50, %v843_v54  ;;  %v854_v60 = vadd.f32 %v852_v55, %v844_v56 }
 0x190   :  { %v858_v5 = vpop.permute.xlu0 %857 }
 0x191   :  { %v860_v59 = vsel %vm495_vm0, %v858_v5, %v856_v51  ;;  %v859_v61 = vsel %vm495_vm0, %v856_v51, %v858_v5 }
 0x192   :  { %v862_v45 = vsel %vm55_vm13, %v860_v59, 0.0  ;;  %v866_v63 = vpop.permute.xlu1 %865  ;;  %v863_v26 = vadd.f32 %v859_v61, %v853_v57 }
 0x193   :  { %v864_v1 = vadd.f32 %v862_v45, %v854_v60 }
 0x194   :  { %v974_v62 = vpop.eup %973  ;;  %v868_v8 = vpop.permute.xlu0 %867 }
 0x195   :  { %v976_v0 = vpop.eup %975  ;;  %535 = vst [vmem:[#allocation5] sm:$0xff] %v974_v62  ;;  %v869_v2 = vsel %vm510_vm14, %v866_v63, %v868_v8  ;;  %v870_v3 = vsel %vm510_vm14, %v868_v8, %v866_v63 }
 0x196   :  { %536 = vst [vmem:[#allocation5 + $0x8] sm:$0xff] %v976_v0  ;;  %v871_v4 = vsel %vm1351_vm7, %v869_v2, 0.0  ;;  %v872_v40 = vsel %vm1438_vm12, %v870_v3, 0.0 }
 0x197   :  { %v873_v6 = vadd.f32 %v871_v4, %v863_v26  ;;  %v874_v7 = vadd.f32 %v872_v40, %v864_v1 }
 0x199   :  { %v953_v9 = vmul.f32 -1.442695, %v873_v6  ;;  %v954_v10 = vmul.f32 -1.442695, %v874_v7 }
 0x19b   :  { %977 = vpow2.f32 %v953_v9 }
 0x19c   :  { %979 = vpow2.f32 %v954_v10 }
 0x1a8   :  { %v978_v11 = vpop.eup %977 }
 0x1a9   :  { %v980_v12 = vpop.eup %979  ;;  %v881_v13 = vadd.f32 1.0, %v978_v11 }
 0x1aa   :  { %v882_v14 = vadd.f32 1.0, %v980_v12 }
 0x1ab   :  { %981 = vrcp.f32 %v881_v13 }
 0x1ac   :  { %983 = vrcp.f32 %v882_v14 }
 0x1b8   :  { %v982_v37 = vpop.eup %981 }
 0x1b9   :  { %v984_v52 = vpop.eup %983  ;;  %888 = vst [vmem:[#allocation5 + $0x10] sm:$0xff] %v982_v37 }
 0x1ba   :  { %889 = vst [vmem:[#allocation5 + $0x18] sm:$0xff] %v984_v52 }
 0x1bb   :  { %1016 = shalt.err (!%p1013_p9)
}
 0x1bc   :  { %901 = dma.vmem_to_hbm [thread:$0]  %s896_s27, 512, %s1525_s5, [#allocation4], %s1030_s21, %s1030_s21, %s1031_s22  }
 0x1bd   :  { %1027 = dma.done.wait [#allocation4], 512  }
 0x1be   :  { %1028 = vsyncadd [#allocation4], 4294966784 }
 0x1bf   :  { %905 = vsyncpa [#allocation3], 1 }
 0x1c0   :  { %906 = vsyncpa [#allocation4], 1 }

</bundles_post_ra>
